<compile_context>
chip_gen: v6e
topology: v6e:2x2x1
jax: 0.10.0
libtpu: 0.0.40
codegen_flags: <defaults>
</compile_context>

<pallas_src>
import functools

import jax
import jax.numpy as jnp
from jax.experimental import pallas as pl
from jax.experimental.pallas import tpu as pltpu


def _mlp_fused_kernel(*refs, num_layers: int):
    """refs = (x, w0, b0, w1, b1, ..., out).

    x:  (B, F_in)        f32
    wl: (F_in_l, F_out_l) bf16  (already transposed to (K, N))
    bl: (1, F_out_l)      f32
    out:(B, F_out_last)   f32
    """
    x_ref = refs[0]
    o_ref = refs[-1]

    h = x_ref[...]                                      # f32 activations
    for l in range(num_layers):
        w_ref = refs[1 + 2 * l]
        b_ref = refs[2 + 2 * l]
        # bf16 MXU inputs, f32 accumulation; plain (M,K)x(K,N) contraction.
        y = jax.lax.dot_general(
            h.astype(jnp.bfloat16), w_ref[...],
            dimension_numbers=(((1,), (0,)), ((), ())),
            preferred_element_type=jnp.float32,
        )
        y = y + b_ref[...]                              # f32 epilogue
        h = jnp.maximum(y, 0.0)                         # ReLU after EVERY layer
    o_ref[...] = h.astype(o_ref.dtype)


def mlp_forward(x, params):
    """Flatten then run every (Linear, ReLU) pair in one fused kernel.

    params: list of (w_t_bf16 (F_in, F_out), b_f32 (1, F_out)).
    """
    B = x.shape[0]
    h = x.reshape(B, -1)                                # nn.Flatten()
    num_layers = len(params)
    f_out = params[-1][0].shape[1]

    flat_inputs = [h]
    for (w_t, b2) in params:
        flat_inputs.extend((w_t, b2))

    kernel = functools.partial(_mlp_fused_kernel, num_layers=num_layers)
    vmem_spec = pl.BlockSpec(memory_space=pltpu.MemorySpace.VMEM)

    return pl.pallas_call(
        kernel,
        out_shape=jax.ShapeDtypeStruct((B, f_out), h.dtype),
        in_specs=[vmem_spec] * len(flat_inputs),
        out_specs=vmem_spec,
    )(*flat_inputs)


def init_mlp_params(key, sizes):
    """PyTorch nn.Linear-style init: U(-1/sqrt(fan_in), +1/sqrt(fan_in)).

    Returns kernel-ready params: weights transposed to (F_in, F_out) and cast
    to bf16, biases as (1, F_out) f32.  Also returns the raw f32 PyTorch-layout
    params for the reference check.
    """
    kernel_params = []
    raw_params = []
    for i in range(1, len(sizes)):
        fan_in, fan_out = sizes[i - 1], sizes[i]
        key, kw, kb = jax.random.split(key, 3)
        bound = 1.0 / jnp.sqrt(fan_in)
        w = jax.random.uniform(kw, (fan_out, fan_in), jnp.float32,
                               minval=-bound, maxval=bound)
        b = jax.random.uniform(kb, (fan_out,), jnp.float32,
                               minval=-bound, maxval=bound)
        raw_params.append((w, b))
        kernel_params.append((w.T.astype(jnp.bfloat16),        # (F_in, F_out) bf16
                              b.reshape(1, fan_out)))          # (1, F_out)   f32
    return kernel_params, raw_params


if __name__ == "__main__":
    key = jax.random.PRNGKey(0)
    k_in, k_p = jax.random.split(key)

    # Input consistent with a flattenable NCHW tensor: (2, 4, 16, 16) -> 1024 feats
    x = jax.random.normal(k_in, (2, 4, 16, 16), jnp.float32)

    sizes = [4 * 16 * 16, 32, 8]        # MLP([1024, 32, 8], activations='ReLU')
    kernel_params, raw_params = init_mlp_params(k_p, sizes)

    out = mlp_forward(x, kernel_params)
    out = jax.block_until_ready(out)
    assert out.shape == (2, 8)

    # Reference 1: same bf16-input / f32-accum math in plain JAX (tight check).
    h = x.reshape(x.shape[0], -1)
    for (w_t, b2) in kernel_params:
        h = jnp.maximum(
            jnp.dot(h.astype(jnp.bfloat16), w_t,
                    preferred_element_type=jnp.float32) + b2, 0.0)
    assert jnp.allclose(out, h, atol=1e-3, rtol=1e-3)

    # Reference 2: full-f32 PyTorch-equivalent math (loose check: bf16 weights).
    h32 = x.reshape(x.shape[0], -1)
    for (w, b) in raw_params:
        h32 = jnp.maximum(h32 @ w.T + b, 0.0)
    assert jnp.allclose(out, h32, atol=5e-2, rtol=5e-2)

    print("KERNEL_OK")
</pallas_src>

<mosaic_0001>
module attributes {stable_mosaic.version = 11 : i64} {
  func.func @_mlp_fused_kernel(%arg0: memref<2x1024xf32, #tpu.memory_space<vmem>>, %arg1: memref<1024x32xbf16, #tpu.memory_space<vmem>>, %arg2: memref<1x32xf32, #tpu.memory_space<vmem>>, %arg3: memref<32x8xbf16, #tpu.memory_space<vmem>>, %arg4: memref<1x8xf32, #tpu.memory_space<vmem>>, %arg5: memref<2x8xf32, #tpu.memory_space<vmem>>) attributes {dimension_semantics = [], scalar_prefetch = 0 : i64, scratch_operands = 0 : i64, tpu.core_type = #tpu.core_type<tc>} {
    %c0 = arith.constant 0 : index
    %c0_0 = arith.constant 0 : index
    %0 = vector.load %arg0[%c0, %c0_0] : memref<2x1024xf32, #tpu.memory_space<vmem>>, vector<2x1024xf32>
    %1 = arith.truncf %0 : vector<2x1024xf32> to vector<2x1024xbf16>
    %c0_1 = arith.constant 0 : index
    %c0_2 = arith.constant 0 : index
    %2 = vector.load %arg1[%c0_1, %c0_2] : memref<1024x32xbf16, #tpu.memory_space<vmem>>, vector<1024x32xbf16>
    %cst = arith.constant dense<0.000000e+00> : vector<2x32xf32>
    %3 = tpu.matmul %1, %2, %cst {dimension_numbers = #tpu.dot_dimension_numbers<[1], [0], [0], [1], [0, 0, 1, 1], [], []>} : vector<2x1024xbf16>, vector<1024x32xbf16>, vector<2x32xf32> -> vector<2x32xf32>
    %c0_3 = arith.constant 0 : index
    %c0_4 = arith.constant 0 : index
    %4 = vector.load %arg2[%c0_3, %c0_4] : memref<1x32xf32, #tpu.memory_space<vmem>>, vector<1x32xf32>
    %5 = vector.broadcast %4 : vector<1x32xf32> to vector<2x32xf32>
    %6 = arith.addf %3, %5 : vector<2x32xf32>
    %cst_5 = arith.constant 0.000000e+00 : f32
    %7 = vector.broadcast %cst_5 : f32 to vector<2x32xf32>
    %8 = arith.maximumf %6, %7 : vector<2x32xf32>
    %9 = arith.truncf %8 : vector<2x32xf32> to vector<2x32xbf16>
    %c0_6 = arith.constant 0 : index
    %c0_7 = arith.constant 0 : index
    %10 = vector.load %arg3[%c0_6, %c0_7] : memref<32x8xbf16, #tpu.memory_space<vmem>>, vector<32x8xbf16>
    %cst_8 = arith.constant dense<0.000000e+00> : vector<2x8xf32>
    %11 = tpu.matmul %9, %10, %cst_8 {dimension_numbers = #tpu.dot_dimension_numbers<[1], [0], [0], [1], [0, 0, 1, 1], [], []>} : vector<2x32xbf16>, vector<32x8xbf16>, vector<2x8xf32> -> vector<2x8xf32>
    %c0_9 = arith.constant 0 : index
    %c0_10 = arith.constant 0 : index
    %12 = vector.load %arg4[%c0_9, %c0_10] : memref<1x8xf32, #tpu.memory_space<vmem>>, vector<1x8xf32>
    %13 = vector.broadcast %12 : vector<1x8xf32> to vector<2x8xf32>
    %14 = arith.addf %11, %13 : vector<2x8xf32>
    %cst_11 = arith.constant 0.000000e+00 : f32
    %15 = vector.broadcast %cst_11 : f32 to vector<2x8xf32>
    %16 = arith.maximumf %14, %15 : vector<2x8xf32>
    %c0_12 = arith.constant 0 : index
    %c0_13 = arith.constant 0 : index
    %17 = vector.load %arg5[%c0_12, %c0_13] : memref<2x8xf32, #tpu.memory_space<vmem>>, vector<2x8xf32>
    tpu.vector_store %arg5[%c0_12, %c0_13], %16 {strides = array<i32>} : memref<2x8xf32, #tpu.memory_space<vmem>>, vector<2x8xf32>,
    return
  }
}

</mosaic_0001>

<bundles_post_ra>
// kernel: tpu_custom_call.1
= control target key start
LH: loop header
LB: loop body
LE: loop exit
PB: predicated region body
PF: predicated region fallthrough
CT: control target
= control target key end

     0   :  { %v30_v28 = vlaneseq  ;;  %v1103_v36 = vmov 1983009808   ;;  %s1356_s0 = inlined_call_operand.vmem [shape: f32[2,1024], index: 0, kind: input, shape index: {}]   ;;  %s1357_s1 = inlined_call_operand.vmem [shape: bf16[1024,32], index: 1, kind: input, shape index: {}]   ;;  %s1358_s2 = inlined_call_operand.vmem [shape: f32[1,32], index: 2, kind: input, shape index: {}]   ;;  %s1359_s3 = inlined_call_operand.vmem [shape: bf16[32,8], index: 3, kind: input, shape index: {}]   ;;  %s1360_s4 = inlined_call_operand.vmem [shape: f32[1,8], index: 4, kind: input, shape index: {}]   ;;  %s1361_s5 = inlined_call_operand.hbm [shape: f32[2,8], index: 5, kind: output, shape index: {}]  }
   0x1   :  { %v1013_v0 = vld [vmem:[%s1357_s1 + $0x78] sm:$0xff]   ;;  %v1017_v4 = vld [vmem:[%s1357_s1 + $0x70] sm:$0xff]   ;;  %v1021_v8 = vld [vmem:[%s1357_s1 + $0x68] sm:$0xff]   ;;  %v28_v37 = vunpack.c.l.s4 %v1103_v36 }
   0x2   :  { %v1014_v1 = vld [vmem:[%s1357_s1 + $0xf8] sm:$0xff]   ;;  %910 = vmatprep.subr.bf16.mxu0 %v1013_v0  ;;  %v1018_v5 = vld [vmem:[%s1357_s1 + $0xf0] sm:$0xff]   ;;  %v1022_v9 = vld [vmem:[%s1357_s1 + $0xe8] sm:$0xff]   ;;  %v31_v33 = vshrl.u32 %v30_v28, 7 }
   0x3   :  { %v1015_v2 = vld [vmem:[%s1357_s1 + $0x38] sm:$0xff]   ;;  %932 = vmatprep.subr.bf16.mxu1 %v1014_v1  ;;  %v1019_v6 = vld [vmem:[%s1357_s1 + $0x30] sm:$0xff]   ;;  %v1023_v10 = vld [vmem:[%s1357_s1 + $0x28] sm:$0xff]   ;;  %v29_v39 = vunpack.c.0.s8 %v28_v37 }
   0x4   :  { %v1016_v3 = vld [vmem:[%s1357_s1 + $0xb8] sm:$0xff]   ;;  %911 = vmatpush3.bf16.msra.mxu0 %v1015_v2  ;;  %v1020_v7 = vld [vmem:[%s1357_s1 + $0xb0] sm:$0xff]   ;;  %v1024_v11 = vld [vmem:[%s1357_s1 + $0xa8] sm:$0xff]  }
   0x5   :  { %933 = vmatpush3.bf16.msra.mxu1 %v1016_v3  ;;  %912 = vmatprep.subr.bf16.mxu0 %v1017_v4  ;;  %v1025_v12 = vld [vmem:[%s1357_s1 + $0x60] sm:$0xff]   ;;  %v1029_v16 = vld [vmem:[%s1357_s1 + $0x58] sm:$0xff]   ;;  %v1033_v20 = vld [vmem:[%s1357_s1 + $0x50] sm:$0xff]   ;;  %v1242_v41 = vsub.s32 %v29_v39, %v31_v33 }
   0x6   :  { %934 = vmatprep.subr.bf16.mxu1 %v1018_v5  ;;  %v1026_v13 = vld [vmem:[%s1357_s1 + $0xe0] sm:$0xff]   ;;  %v1030_v17 = vld [vmem:[%s1357_s1 + $0xd8] sm:$0xff]   ;;  %v1034_v21 = vld [vmem:[%s1357_s1 + $0xd0] sm:$0xff]  }
   0x7   :  { %v1027_v14 = vld [vmem:[%s1357_s1 + $0x20] sm:$0xff]   ;;  %v1031_v18 = vld [vmem:[%s1357_s1 + $0x18] sm:$0xff]   ;;  %v1035_v22 = vld [vmem:[%s1357_s1 + $0x10] sm:$0xff]  }
   0x8   :  { %913 = vmatpush3.bf16.msra.mxu0 %v1019_v6  ;;  %v1028_v15 = vld [vmem:[%s1357_s1 + $0xa0] sm:$0xff]   ;;  %v1032_v19 = vld [vmem:[%s1357_s1 + $0x98] sm:$0xff]   ;;  %v1036_v23 = vld [vmem:[%s1357_s1 + $0x90] sm:$0xff]  }
   0x9   :  { %935 = vmatpush3.bf16.msra.mxu1 %v1020_v7  ;;  %914 = vmatprep.subr.bf16.mxu0 %v1021_v8  ;;  %v1037_v24 = vld [vmem:[%s1357_s1 + $0x48] sm:$0xff]   ;;  %v1041_v29 = vld [vmem:[%s1357_s1 + $0x40] sm:$0xff]   ;;  %v1046_v35 = vld [vmem:[%s1357_s1 + $0x178] sm:$0xff]  }
   0xa   :  { %936 = vmatprep.subr.bf16.mxu1 %v1022_v9  ;;  %v1038_v25 = vld [vmem:[%s1357_s1 + $0xc8] sm:$0xff]   ;;  %v1042_v30 = vld [vmem:[%s1357_s1 + $0xc0] sm:$0xff]   ;;  %v1047_v38 = vld [vmem:[%s1357_s1 + $0x1f8] sm:$0xff]  }
   0xb   :  { %v1039_v26 = vld [vmem:[%s1357_s1 + $0x8] sm:$0xff]   ;;  %v1043_v31 = vld [vmem:[%s1357_s1] sm:$0xff]   ;;  %v1048_v46 = vld [vmem:[%s1357_s1 + $0x138] sm:$0xff]  }
   0xc   :  { %915 = vmatpush3.bf16.msra.mxu0 %v1023_v10  ;;  %v1040_v27 = vld [vmem:[%s1357_s1 + $0x88] sm:$0xff]   ;;  %v1044_v32 = vld [vmem:[%s1357_s1 + $0x80] sm:$0xff]   ;;  %v1049_v49 = vld [vmem:[%s1357_s1 + $0x1b8] sm:$0xff]  }
   0xd   :  { %937 = vmatpush3.bf16.msra.mxu1 %v1024_v11  ;;  %916 = vmatprep.subr.bf16.mxu0 %v1025_v12  ;;  %v22_v34 = vld [vmem:[%s1356_s0] sm:$0xff]  ;;  %v1050_v52 = vld [vmem:[%s1357_s1 + $0x170] sm:$0xff]   ;;  %v1054_v56 = vld [vmem:[%s1357_s1 + $0x168] sm:$0xff]  }
   0xe   :  { %938 = vmatprep.subr.bf16.mxu1 %v1026_v13  ;;  %v26_v40 = vcombine.high %v22_v34, %v22_v34  ;;  %v33_v42 = vrot.slane %v22_v34, %v1242_v41  ;;  %v1051_v53 = vld [vmem:[%s1357_s1 + $0x1f0] sm:$0xff]   ;;  %v1055_v57 = vld [vmem:[%s1357_s1 + $0x1e8] sm:$0xff]   ;;  %v1058_v60 = vld [vmem:[%s1357_s1 + $0x160] sm:$0xff]  }
   0xf   :  { %v1052_v54 = vld [vmem:[%s1357_s1 + $0x130] sm:$0xff]   ;;  %v1056_v58 = vld [vmem:[%s1357_s1 + $0x128] sm:$0xff]   ;;  %v1059_v61 = vld [vmem:[%s1357_s1 + $0x1e0] sm:$0xff]  }
  0x10   :  { %917 = vmatpush3.bf16.msra.mxu0 %v1027_v14  ;;  %v40_v43 = vrot.slane %v26_v40, %v1242_v41  ;;  %v41_v44 = vcombine.high %v33_v42, %v33_v42  ;;  %v68_v47 = vpack.c.bf16 %v33_v42, %v33_v42  ;;  %v1053_v55 = vld [vmem:[%s1357_s1 + $0x1b0] sm:$0xff]   ;;  %v1057_v59 = vld [vmem:[%s1357_s1 + $0x1a8] sm:$0xff]   ;;  %v1060_v62 = vld [vmem:[%s1357_s1 + $0x120] sm:$0xff]  }
  0x11   :  { %939 = vmatpush3.bf16.msra.mxu1 %v1028_v15  ;;  %918 = vmatprep.subr.bf16.mxu0 %v1029_v16  ;;  %v1061_v63 = vld [vmem:[%s1357_s1 + $0x1a0] sm:$0xff]   ;;  %v1062_v0 = vld [vmem:[%s1357_s1 + $0x158] sm:$0xff]   ;;  %v1066_v4 = vld [vmem:[%s1357_s1 + $0x150] sm:$0xff]  }
  0x12   :  { %940 = vmatprep.subr.bf16.mxu1 %v1030_v17  ;;  %v42_v45 = vcombine.high %v40_v43, %v40_v43  ;;  %v70_v48 = vpack.c.bf16 %v40_v43, %v40_v43  ;;  %v69_v50 = vpack.c.bf16 %v41_v44, %v41_v44  ;;  %v1063_v1 = vld [vmem:[%s1357_s1 + $0x1d8] sm:$0xff]   ;;  %v1067_v5 = vld [vmem:[%s1357_s1 + $0x1d0] sm:$0xff]   ;;  %v1070_v8 = vld [vmem:[%s1357_s1 + $0x148] sm:$0xff]  }
  0x13   :  { %v1064_v2 = vld [vmem:[%s1357_s1 + $0x118] sm:$0xff]   ;;  %v1068_v6 = vld [vmem:[%s1357_s1 + $0x110] sm:$0xff]   ;;  %v1071_v9 = vld [vmem:[%s1357_s1 + $0x1c8] sm:$0xff]  }
  0x14   :  { %919 = vmatpush3.bf16.msra.mxu0 %v1031_v18  ;;  %v71_v51 = vpack.c.bf16 %v42_v45, %v42_v45  ;;  %627 = vmatprep.mubr.bf16.mxu0 %v69_v50  ;;  %v1065_v3 = vld [vmem:[%s1357_s1 + $0x198] sm:$0xff]   ;;  %v1069_v7 = vld [vmem:[%s1357_s1 + $0x190] sm:$0xff]   ;;  %v23_v10 = vld [vmem:[%s1356_s0 + $0x8] sm:$0xff] }
  0x15   :  { %941 = vmatpush3.bf16.msra.mxu1 %v1032_v19  ;;  %920 = vmatprep.subr.bf16.mxu0 %v1033_v20  ;;  %v50_v11 = vrot.slane %v23_v10, %v1242_v41  ;;  %v43_v12 = vcombine.high %v23_v10, %v23_v10 }
  0x16   :  { %942 = vmatprep.subr.bf16.mxu1 %v1034_v21  ;;  %667 = vmatprep.mubr.bf16.mxu1 %v71_v51 }
  0x18   :  { %921 = vmatpush3.bf16.msra.mxu0 %v1035_v22 }
  0x19   :  { %943 = vmatpush3.bf16.msra.mxu1 %v1036_v23  ;;  %922 = vmatprep.subr.bf16.mxu0 %v1037_v24 }
  0x1a   :  { %944 = vmatprep.subr.bf16.mxu1 %v1038_v25 }
  0x1c   :  { %923 = vmatpush3.bf16.msra.mxu0 %v1039_v26 }
  0x1d   :  { %945 = vmatpush3.bf16.msra.mxu1 %v1040_v27  ;;  %924 = vmatprep.subr.bf16.mxu0 %v1041_v29 }
  0x1e   :  { %946 = vmatprep.subr.bf16.mxu1 %v1042_v30 }
  0x20   :  { %925 = vmatpush3.bf16.msra.mxu0 %v1043_v31 }
  0x21   :  { %947 = vmatpush3.bf16.msra.mxu1 %v1044_v32  ;;  %954 = vmatprep.subr.bf16.mxu0 %v1046_v35 }
  0x22   :  { %976 = vmatprep.subr.bf16.mxu1 %v1047_v38 }
  0x23   :  { %628 = vmatmul.mubr.bf16.vlgmr.msra.gmra.mxu0 %v68_v47 }
  0x24   :  { %668 = vmatmul.mubr.bf16.vlgmr.msra.gmra.mxu1 %v70_v48  ;;  %955 = vmatpush3.bf16.msra.mxu0 %v1048_v46 }
  0x25   :  { %977 = vmatpush3.bf16.msra.mxu1 %v1049_v49  ;;  %956 = vmatprep.subr.bf16.mxu0 %v1050_v52 }
  0x26   :  { %978 = vmatprep.subr.bf16.mxu1 %v1051_v53 }
  0x28   :  { %957 = vmatpush3.bf16.msra.mxu0 %v1052_v54 }
  0x29   :  { %979 = vmatpush3.bf16.msra.mxu1 %v1053_v55  ;;  %958 = vmatprep.subr.bf16.mxu0 %v1054_v56 }
  0x2a   :  { %980 = vmatprep.subr.bf16.mxu1 %v1055_v57 }
  0x2c   :  { %959 = vmatpush3.bf16.msra.mxu0 %v1056_v58 }
  0x2d   :  { %981 = vmatpush3.bf16.msra.mxu1 %v1057_v59  ;;  %960 = vmatprep.subr.bf16.mxu0 %v1058_v60 }
  0x2e   :  { %982 = vmatprep.subr.bf16.mxu1 %v1059_v61 }
  0x30   :  { %961 = vmatpush3.bf16.msra.mxu0 %v1060_v62 }
  0x31   :  { %983 = vmatpush3.bf16.msra.mxu1 %v1061_v63  ;;  %962 = vmatprep.subr.bf16.mxu0 %v1062_v0 }
  0x32   :  { %984 = vmatprep.subr.bf16.mxu1 %v1063_v1 }
  0x34   :  { %963 = vmatpush3.bf16.msra.mxu0 %v1064_v2 }
  0x35   :  { %985 = vmatpush3.bf16.msra.mxu1 %v1065_v3  ;;  %964 = vmatprep.subr.bf16.mxu0 %v1066_v4 }
  0x36   :  { %986 = vmatprep.subr.bf16.mxu1 %v1067_v5 }
  0x37   :  { %10 = vsyncpa [#allocation3], 0  ;;  %v1072_v13 = vld [vmem:[%s1357_s1 + $0x108] sm:$0xff]   ;;  %v58_v15 = vcombine.high %v50_v11, %v50_v11  ;;  %v57_v16 = vrot.slane %v43_v12, %v1242_v41  ;;  %v1074_v17 = vld [vmem:[%s1357_s1 + $0x140] sm:$0xff]   ;;  %v72_v24 = vpack.c.bf16 %v50_v11, %v50_v11  ;;  %v1104_v27 = vmov 0.0   ;;  %s1106_s29 = smov [#allocation2]  }
  0x38   :  { %965 = vmatpush3.bf16.msra.mxu0 %v1068_v6  ;;  %v1073_v14 = vld [vmem:[%s1357_s1 + $0x188] sm:$0xff]   ;;  %v1075_v18 = vld [vmem:[%s1357_s1 + $0x1c0] sm:$0xff]   ;;  %vm1105_vm0 = vmmov 0   ;;  %vm780_vm1 = vcmask 261120   ;;  %s833_s30 = sshll.u32 %s1106_s29, 4  ;;  %vm825_vm2 = vcmask 58368   ;;  %s834_s30 = int_to_ptr.vmem [resolvable:$true] %s833_s30 }
  0x39   :  { %987 = vmatpush3.bf16.msra.mxu1 %v1069_v7  ;;  %966 = vmatprep.subr.bf16.mxu0 %v1070_v8  ;;  %v73_v19 = vpack.c.bf16 %v58_v15, %v58_v15  ;;  %v59_v20 = vcombine.high %v57_v16, %v57_v16  ;;  %v1076_v21 = vld [vmem:[%s1357_s1 + $0x100] sm:$0xff]   ;;  %v74_v25 = vpack.c.bf16 %v57_v16, %v57_v16  ;;  %v1079_v26 = vld [vmem:[%s1359_s3 + $0x8] sm:$0xff]   ;;  %s1081_s6 = scalar_lea.vmem %s834_s30, 32  ;;  %p1086_p1 = scmp.lt.s32.totalorder %s834_s30, %s834_s30 }
  0x3a   :  { %988 = vmatprep.subr.bf16.mxu1 %v1071_v9  ;;  %v1077_v22 = vld [vmem:[%s1357_s1 + $0x180] sm:$0xff]   ;;  %p1082_p0 = scmp.ne.s32.totalorder %s834_s30, %s1081_s6  ;;  %p1087_p2 = scmp.lt.s32.totalorder %s1081_s6, %s1081_s6 }
  0x3b   :  { %v75_v23 = vpack.c.bf16 %v59_v20, %v59_v20  ;;  %707 = vmatprep.mubr.bf16.mxu0 %v73_v19  ;;  %v1080_v28 = vld [vmem:[%s1359_s3] sm:$0xff]  }
  0x3c   :  { %967 = vmatpush3.bf16.msra.mxu0 %v1072_v13  ;;  %v841_v38 = vld [vmem:[%s1358_s2] ss:$0 sm:$0xff]  ;;  %p1088_p3 = por %p1087_p2, %p1086_p1 }
  0x3d   :  { %989 = vmatpush3.bf16.msra.mxu1 %v1073_v14  ;;  %968 = vmatprep.subr.bf16.mxu0 %v1074_v17  ;;  %v906_v56 = vld [vmem:[%s1360_s4] ss:$0 sm:$0xff] }
  0x3e   :  { %990 = vmatprep.subr.bf16.mxu1 %v1075_v18  ;;  %747 = vmatprep.mubr.bf16.mxu1 %v75_v23  ;;  %p1089_p4 = pnand %p1088_p3, %p1082_p0 }
  0x40   :  { %969 = vmatpush3.bf16.msra.mxu0 %v1076_v21 }
  0x41   :  { %991 = vmatpush3.bf16.msra.mxu1 %v1077_v22  ;;  %1001 = vmatprep.subr.bf16.mxu0 %v1104_v27 }
  0x43   :  { %708 = vmatmul.mubr.bf16.vlgmr.msra.gmra.mxu0 %v72_v24 }
  0x44   :  { %748 = vmatmul.mubr.bf16.vlgmr.msra.gmra.mxu1 %v74_v25  ;;  %1002 = vmatpush3.bf16.msra.mxu0 %v1079_v26 }
  0x45   :  { %1003 = vmatprep.subr.bf16.mxu0 %v1104_v27  ;;  %1005 = vmatprep.mubr.msk.bf16.mxu0 %vm1105_vm0, %v1104_v27 }
  0x48   :  { %1004 = vmatpush3.bf16.msra.mxu0 %v1080_v28 }
  0xe3   :  { %v926_v29 = vpop.f32.mrf.mxu0 }
  0xe4   :  { %v948_v30 = vpop.f32.mrf.mxu1 }
  0xe5   :  { %v927_v31 = vpop.f32.mrf.mxu0 }
  0xe6   :  { %v949_v32 = vpop.f32.mrf.mxu1  ;;  %v928_v37 = vadd.f32 %v927_v31, %v926_v29 }
  0xe7   :  { %v929_v33 = vpop.f32.mrf.mxu0  ;;  %v950_v40 = vadd.f32 %v949_v32, %v948_v30 }
  0xe8   :  { %v951_v34 = vpop.f32.mrf.mxu1  ;;  %v630_v39 = vadd.f32 %v928_v37, %v841_v38 }
  0xe9   :  { %v930_v35 = vpop.f32.mrf.mxu0 }
  0xea   :  { %v952_v36 = vpop.f32.mrf.mxu1  ;;  %v670_v45 = vadd.f32 %v950_v40, %v630_v39 }
 0x103   :  { %v970_v41 = vpop.f32.mrf.mxu0 }
 0x104   :  { %v992_v42 = vpop.f32.mrf.mxu1 }
 0x105   :  { %v971_v43 = vpop.f32.mrf.mxu0 }
 0x106   :  { %v993_v44 = vpop.f32.mrf.mxu1  ;;  %v972_v46 = vadd.f32 %v971_v43, %v970_v41 }
 0x107   :  { %v973_v47 = vpop.f32.mrf.mxu0  ;;  %v994_v50 = vadd.f32 %v993_v44, %v992_v42 }
 0x108   :  { %v995_v48 = vpop.f32.mrf.mxu1  ;;  %v710_v49 = vadd.f32 %v972_v46, %v670_v45 }
 0x109   :  { %v974_v51 = vpop.f32.mrf.mxu0 }
 0x10a   :  { %v996_v52 = vpop.f32.mrf.mxu1  ;;  %v750_v53 = vadd.f32 %v994_v50, %v710_v49 }
 0x10c   :  { %v755_v54 = vmax.f32 %v750_v53, 0.0 }
 0x10e   :  { %v756_v55 = vpack.c.bf16 %v755_v54, %v755_v54 }
 0x110   :  { %1006 = vmatmul.mubr.msk.bf16.vlgmr.msra.gmra.mxu0 %vm780_vm1, %v756_v55 }
 0x1d0   :  { %v818_v57 = vpop.f32.mrf.mxu0 }
 0x1d1   :  { %v819_v58 = vadd.f32 %v906_v56, %v818_v57 }
 0x1d2   :  { %v1007_v59 = vpop.f32.mrf.mxu0 }
 0x1d3   :  { %v824_v60 = vmax.f32 %v819_v58, 0.0 }
 0x1d4   :  { %v821_v61 = vpop.f32.mrf.mxu0 }
 0x1d5   :  { %826 = vst.msk [vmem:[#allocation2] sm:$0x3] %vm825_vm2, %v824_v60 }
 0x1d6   :  { %v1008_v62 = vpop.f32.mrf.mxu0 }
 0x1d7   :  { %1092 = shalt.err (!%p1089_p4)
}
 0x1d8   :  { %836 = dma.vmem_to_hbm [thread:$0]  %s834_s30, 32, %s1361_s5, [#allocation3]  }
 0x1d9   :  { %1101 = dma.done.wait [#allocation3], 32  }
 0x1da   :  { %1102 = vsyncadd [#allocation3], 4294967264 }
 0x1db   :  { %840 = vsyncpa [#allocation3], 1 }

</bundles_post_ra>
